<compile_context>
chip_gen: v5e
topology: v5e:2x2
jax: 0.10.0
libtpu: 0.0.40
codegen_flags: <defaults>
</compile_context>

<pallas_src>
import functools

import jax
import jax.numpy as jnp
from jax.experimental import pallas as pl
from jax.experimental.pallas import tpu as pltpu


def _dw_block_kernel(x_ref, wdw_ref, b1_ref, wpw_ref, b2_ref, o_ref, *,
                     stride, TH, Wo):
    """Fused: depthwise 3x3 -> BN1(shift)+ReLU -> 1x1 (bf16 MXU) -> BN2(shift)+ReLU.

    x_ref : (1, Hp, Wp, Cin)  padded NHWC input (whole image, resident per n)
    wdw_ref: (9, Cin)         depthwise weights, tap-major, BN1 scale folded in
    b1_ref : (1, Cin)         folded BN1 shift (dw-conv bias folded in)
    wpw_ref: (Cin, Cout)      pointwise weights (bf16), BN2 scale folded in
    b2_ref : (1, Cout)        folded BN2 shift (pw-conv bias folded in)
    o_ref : (1, TH, Wo, Cout) output row strip
    """
    Cin = x_ref.shape[-1]
    Cout = o_ref.shape[-1]

    r = pl.program_id(1)                      # row-strip index
    Hin = (TH - 1) * stride + 3               # input rows needed (with halo)
    row0 = pl.multiple_of(r * (TH * stride), TH * stride)

    # Row strip of the padded input (H is not a vreg dim -> cheap row select).
    x = x_ref[0, pl.ds(row0, Hin), :, :].astype(jnp.float32)   # (Hin, Wp, Cin)

    # ---- depthwise 3x3 conv: 9 shifted elementwise MACs on the VPU ----
    acc = jnp.zeros((TH, Wo, Cin), jnp.float32)
    for kh in range(3):
        for kw in range(3):
            if stride == 1:
                patch = jax.lax.slice(x, (kh, kw, 0), (kh + TH, kw + Wo, Cin))
            else:
                patch = jax.lax.slice(
                    x, (kh, kw, 0),
                    (kh + (TH - 1) * stride + 1,
                     kw + (Wo - 1) * stride + 1, Cin),
                    (stride, stride, 1))
            tap = kh * 3 + kw
            w = wdw_ref[tap:tap + 1, :].astype(jnp.float32)    # (1, Cin)
            acc = acc + patch * w[None, :, :]                  # bcast (1,1,Cin)

    # ---- BN1 shift + ReLU (scale already folded into wdw on host) ----
    y = jnp.maximum(acc + b1_ref[...][None, :, :], 0.0)

    # ---- pointwise 1x1 conv == bf16 MXU matmul with f32 accumulation ----
    y2 = jnp.dot(y.reshape(TH * Wo, Cin).astype(jnp.bfloat16),
                 wpw_ref[...],
                 preferred_element_type=jnp.float32)

    # ---- BN2 shift + ReLU (scale already folded into wpw on host) ----
    y2 = jnp.maximum(y2 + b2_ref[...], 0.0)

    o_ref[0] = y2.reshape(TH, Wo, Cout).astype(o_ref.dtype)


def _pick_tile_rows(Ho, target=8):
    """Largest divisor of Ho that is <= target (keeps strips big enough to
    amortize the ~0.35us grid-step overhead but bounded for VMEM)."""
    th = min(target, Ho)
    while Ho % th != 0:
        th -= 1
    return th


def dw_conv_block(x_nchw, params, stride):
    """Forward pass of DW_Conv_Block. x_nchw: (N, Cin, H, W) float32."""
    N, Cin, H, W = x_nchw.shape
    eps = 1e-5
    pad = 4 if Cin == 1024 else 1          # matches the PyTorch module
    Ho = (H + 2 * pad - 3) // stride + 1
    Wo = (W + 2 * pad - 3) // stride + 1

    wdw = params["wdw"]          # (Cin, 1, 3, 3)
    bdw = params["bdw"]          # (Cin,)
    wpw = params["wpw"]          # (Cout, Cin, 1, 1)
    bpw = params["bpw"]          # (Cout,)
    Cout = wpw.shape[0]

    # NCHW -> NHWC + spatial zero padding (glue, plain JAX).
    x_nhwc = jnp.transpose(x_nchw, (0, 2, 3, 1))
    x_pad = jnp.pad(x_nhwc, ((0, 0), (pad, pad), (pad, pad), (0, 0)))
    Hp, Wp = H + 2 * pad, W + 2 * pad

    # Fold BN (eval mode) scales into the conv weights, biases into the shifts.
    scale1 = params["g1"] / jnp.sqrt(params["v1"] + eps)
    scale2 = params["g2"] / jnp.sqrt(params["v2"] + eps)

    # Depthwise weight (Cin,1,3,3) -> (9, Cin) tap-major, times BN1 scale.
    wdw2 = (jnp.transpose(wdw[:, 0], (1, 2, 0)).reshape(9, Cin)
            * scale1[None, :]).astype(jnp.float32)
    b1 = (scale1 * (bdw - params["m1"]) + params["b1"]
          ).reshape(1, Cin).astype(jnp.float32)

    # Pointwise weight (Cout,Cin,1,1) -> (Cin, Cout) times BN2 scale, bf16 in HBM.
    wpw2 = (jnp.transpose(wpw[:, :, 0, 0], (1, 0))
            * scale2[None, :]).astype(jnp.bfloat16)
    b2 = (scale2 * (bpw - params["m2"]) + params["b2"]
          ).reshape(1, Cout).astype(jnp.float32)

    # Row-strip tiling of the output.
    TH = _pick_tile_rows(Ho, target=8)
    n_strips = Ho // TH

    kernel = functools.partial(_dw_block_kernel, stride=stride, TH=TH, Wo=Wo)

    out_nhwc = pl.pallas_call(
        kernel,
        out_shape=jax.ShapeDtypeStruct((N, Ho, Wo, Cout), jnp.float32),
        grid_spec=pltpu.PrefetchScalarGridSpec(
            num_scalar_prefetch=0,
            grid=(N, n_strips),
            in_specs=[
                # Padded image stays resident across the strip axis; the kernel
                # slices its rows (incl. halo) with pl.ds.
                pl.BlockSpec((1, Hp, Wp, Cin), lambda n, r: (n, 0, 0, 0)),
                pl.BlockSpec((9, Cin), lambda n, r: (0, 0)),
                pl.BlockSpec((1, Cin), lambda n, r: (0, 0)),
                pl.BlockSpec((Cin, Cout), lambda n, r: (0, 0)),
                pl.BlockSpec((1, Cout), lambda n, r: (0, 0)),
            ],
            out_specs=pl.BlockSpec((1, TH, Wo, Cout),
                                   lambda n, r: (n, r, 0, 0)),
        ),
        compiler_params=pltpu.CompilerParams(
            dimension_semantics=("parallel", "parallel"),
            vmem_limit_bytes=32 * 1024 * 1024),
    )(x_pad, wdw2, b1, wpw2, b2)

    return jnp.transpose(out_nhwc, (0, 3, 1, 2))  # back to NCHW


def reference(x_nchw, params, stride):
    """Plain-JAX reference (eval-mode BN), NCHW, f32 throughout."""
    eps = 1e-5
    Cin = x_nchw.shape[1]
    pad = 4 if Cin == 1024 else 1
    y = jax.lax.conv_general_dilated(
        x_nchw, params["wdw"], window_strides=(stride, stride),
        padding=[(pad, pad), (pad, pad)], feature_group_count=Cin,
        dimension_numbers=("NCHW", "OIHW", "NCHW"))
    y = y + params["bdw"][None, :, None, None]
    y = (y - params["m1"][None, :, None, None]) / jnp.sqrt(
        params["v1"] + eps)[None, :, None, None]
    y = y * params["g1"][None, :, None, None] + params["b1"][None, :, None, None]
    y = jnp.maximum(y, 0.0)
    y = jax.lax.conv_general_dilated(
        y, params["wpw"], window_strides=(1, 1), padding=[(0, 0), (0, 0)],
        dimension_numbers=("NCHW", "OIHW", "NCHW"))
    y = y + params["bpw"][None, :, None, None]
    y = (y - params["m2"][None, :, None, None]) / jnp.sqrt(
        params["v2"] + eps)[None, :, None, None]
    y = y * params["g2"][None, :, None, None] + params["b2"][None, :, None, None]
    return jnp.maximum(y, 0.0)


if __name__ == "__main__":
    N, Cin, Cout, H, W, stride = 2, 8, 16, 16, 16, 1

    key = jax.random.PRNGKey(0)
    ks = jax.random.split(key, 13)
    x = jax.random.normal(ks[0], (N, Cin, H, W), jnp.float32)

    params = {
        # dw conv: Conv2d(Cin, Cin, 3, groups=Cin) -> weight (Cin,1,3,3), bias (Cin,)
        "wdw": 0.2 * jax.random.normal(ks[1], (Cin, 1, 3, 3), jnp.float32),
        "bdw": 0.1 * jax.random.normal(ks[2], (Cin,), jnp.float32),
        # pw conv: Conv2d(Cin, Cout, 1) -> weight (Cout,Cin,1,1), bias (Cout,)
        "wpw": 0.2 * jax.random.normal(ks[3], (Cout, Cin, 1, 1), jnp.float32),
        "bpw": 0.1 * jax.random.normal(ks[4], (Cout,), jnp.float32),
        # BN1 (over Cin)
        "g1": 1.0 + 0.1 * jax.random.normal(ks[5], (Cin,), jnp.float32),
        "b1": 0.1 * jax.random.normal(ks[6], (Cin,), jnp.float32),
        "m1": 0.1 * jax.random.normal(ks[7], (Cin,), jnp.float32),
        "v1": 0.5 + jnp.abs(jax.random.normal(ks[8], (Cin,), jnp.float32)),
        # BN2 (over Cout)
        "g2": 1.0 + 0.1 * jax.random.normal(ks[9], (Cout,), jnp.float32),
        "b2": 0.1 * jax.random.normal(ks[10], (Cout,), jnp.float32),
        "m2": 0.1 * jax.random.normal(ks[11], (Cout,), jnp.float32),
        "v2": 0.5 + jnp.abs(jax.random.normal(ks[12], (Cout,), jnp.float32)),
    }

    out = dw_conv_block(x, params, stride)
    out = jax.block_until_ready(out)

    ref = jax.block_until_ready(reference(x, params, stride))
    assert out.shape == ref.shape, (out.shape, ref.shape)
    # Tolerance loosened for the bf16 pointwise matmul (f32 accumulation).
    assert jnp.allclose(out, ref, rtol=5e-2, atol=5e-2), float(
        jnp.max(jnp.abs(out - ref)))

    print("KERNEL_OK")
</pallas_src>

<mosaic_0001>
module attributes {stable_mosaic.version = 11 : i64} {
  func.func @_dw_block_kernel(%arg0: i32, %arg1: i32, %arg2: memref<1x18x18x8xf32, #tpu.memory_space<vmem>>, %arg3: memref<9x8xf32, #tpu.memory_space<vmem>>, %arg4: memref<1x8xf32, #tpu.memory_space<vmem>>, %arg5: memref<8x16xbf16, #tpu.memory_space<vmem>>, %arg6: memref<1x16xf32, #tpu.memory_space<vmem>>, %arg7: memref<1x8x16x16xf32, #tpu.memory_space<vmem>>) attributes {dimension_semantics = [#tpu.dimension_semantics<parallel>, #tpu.dimension_semantics<parallel>], iteration_bounds = array<i64: 2, 2>, scalar_prefetch = 0 : i64, scratch_operands = 0 : i64, tpu.core_type = #tpu.core_type<tc>, window_params = [{transform_indices = @transform_0, window_bounds = array<i64: 1, 18, 18, 8>}, {pipeline_mode = #tpu.pipeline_mode<synchronous>, transform_indices = @transform_1, window_bounds = array<i64: 9, 8>}, {pipeline_mode = #tpu.pipeline_mode<synchronous>, transform_indices = @transform_2, window_bounds = array<i64: 1, 8>}, {pipeline_mode = #tpu.pipeline_mode<synchronous>, transform_indices = @transform_3, window_bounds = array<i64: 8, 16>}, {pipeline_mode = #tpu.pipeline_mode<synchronous>, transform_indices = @transform_4, window_bounds = array<i64: 1, 16>}, {transform_indices = @transform_5, window_bounds = array<i64: 1, 8, 16, 16>}]} {
    %c8_i32 = arith.constant 8 : i32
    %0 = arith.muli %arg1, %c8_i32 : i32
    %1 = tpu.assume_multiple %0, 8 : i32
    %c0 = arith.constant 0 : index
    %2 = arith.index_cast %1 : i32 to index
    %c0_0 = arith.constant 0 : index
    %c0_1 = arith.constant 0 : index
    %3 = vector.load %arg2[%c0, %2, %c0_0, %c0_1] : memref<1x18x18x8xf32, #tpu.memory_space<vmem>>, vector<1x10x18x8xf32>
    %4 = vector.shape_cast %3 : vector<1x10x18x8xf32> to vector<10x18x8xf32>
    %cst = arith.constant 0.000000e+00 : f32
    %5 = vector.broadcast %cst : f32 to vector<8x16x8xf32>
    %6 = vector.extract_strided_slice %4 {offsets = [0, 0, 0], sizes = [8, 16, 8], strides = [1, 1, 1]} : vector<10x18x8xf32> to vector<8x16x8xf32>
    %c0_2 = arith.constant 0 : index
    %c0_3 = arith.constant 0 : index
    %7 = vector.load %arg3[%c0_2, %c0_3] : memref<9x8xf32, #tpu.memory_space<vmem>>, vector<1x8xf32>
    %8 = vector.shape_cast %7 : vector<1x8xf32> to vector<1x1x8xf32>
    %9 = vector.broadcast %8 : vector<1x1x8xf32> to vector<8x16x8xf32>
    %10 = arith.mulf %6, %9 : vector<8x16x8xf32>
    %11 = arith.addf %5, %10 : vector<8x16x8xf32>
    %12 = vector.extract_strided_slice %4 {offsets = [0, 1, 0], sizes = [8, 16, 8], strides = [1, 1, 1]} : vector<10x18x8xf32> to vector<8x16x8xf32>
    %c1 = arith.constant 1 : index
    %c0_4 = arith.constant 0 : index
    %13 = vector.load %arg3[%c1, %c0_4] : memref<9x8xf32, #tpu.memory_space<vmem>>, vector<1x8xf32>
    %14 = vector.shape_cast %13 : vector<1x8xf32> to vector<1x1x8xf32>
    %15 = vector.broadcast %14 : vector<1x1x8xf32> to vector<8x16x8xf32>
    %16 = arith.mulf %12, %15 : vector<8x16x8xf32>
    %17 = arith.addf %11, %16 : vector<8x16x8xf32>
    %18 = vector.extract_strided_slice %4 {offsets = [0, 2, 0], sizes = [8, 16, 8], strides = [1, 1, 1]} : vector<10x18x8xf32> to vector<8x16x8xf32>
    %c2 = arith.constant 2 : index
    %c0_5 = arith.constant 0 : index
    %19 = vector.load %arg3[%c2, %c0_5] : memref<9x8xf32, #tpu.memory_space<vmem>>, vector<1x8xf32>
    %20 = vector.shape_cast %19 : vector<1x8xf32> to vector<1x1x8xf32>
    %21 = vector.broadcast %20 : vector<1x1x8xf32> to vector<8x16x8xf32>
    %22 = arith.mulf %18, %21 : vector<8x16x8xf32>
    %23 = arith.addf %17, %22 : vector<8x16x8xf32>
    %24 = vector.extract_strided_slice %4 {offsets = [1, 0, 0], sizes = [8, 16, 8], strides = [1, 1, 1]} : vector<10x18x8xf32> to vector<8x16x8xf32>
    %c3 = arith.constant 3 : index
    %c0_6 = arith.constant 0 : index
    %25 = vector.load %arg3[%c3, %c0_6] : memref<9x8xf32, #tpu.memory_space<vmem>>, vector<1x8xf32>
    %26 = vector.shape_cast %25 : vector<1x8xf32> to vector<1x1x8xf32>
    %27 = vector.broadcast %26 : vector<1x1x8xf32> to vector<8x16x8xf32>
    %28 = arith.mulf %24, %27 : vector<8x16x8xf32>
    %29 = arith.addf %23, %28 : vector<8x16x8xf32>
    %30 = vector.extract_strided_slice %4 {offsets = [1, 1, 0], sizes = [8, 16, 8], strides = [1, 1, 1]} : vector<10x18x8xf32> to vector<8x16x8xf32>
    %c4 = arith.constant 4 : index
    %c0_7 = arith.constant 0 : index
    %31 = vector.load %arg3[%c4, %c0_7] : memref<9x8xf32, #tpu.memory_space<vmem>>, vector<1x8xf32>
    %32 = vector.shape_cast %31 : vector<1x8xf32> to vector<1x1x8xf32>
    %33 = vector.broadcast %32 : vector<1x1x8xf32> to vector<8x16x8xf32>
    %34 = arith.mulf %30, %33 : vector<8x16x8xf32>
    %35 = arith.addf %29, %34 : vector<8x16x8xf32>
    %36 = vector.extract_strided_slice %4 {offsets = [1, 2, 0], sizes = [8, 16, 8], strides = [1, 1, 1]} : vector<10x18x8xf32> to vector<8x16x8xf32>
    %c5 = arith.constant 5 : index
    %c0_8 = arith.constant 0 : index
    %37 = vector.load %arg3[%c5, %c0_8] : memref<9x8xf32, #tpu.memory_space<vmem>>, vector<1x8xf32>
    %38 = vector.shape_cast %37 : vector<1x8xf32> to vector<1x1x8xf32>
    %39 = vector.broadcast %38 : vector<1x1x8xf32> to vector<8x16x8xf32>
    %40 = arith.mulf %36, %39 : vector<8x16x8xf32>
    %41 = arith.addf %35, %40 : vector<8x16x8xf32>
    %42 = vector.extract_strided_slice %4 {offsets = [2, 0, 0], sizes = [8, 16, 8], strides = [1, 1, 1]} : vector<10x18x8xf32> to vector<8x16x8xf32>
    %c6 = arith.constant 6 : index
    %c0_9 = arith.constant 0 : index
    %43 = vector.load %arg3[%c6, %c0_9] : memref<9x8xf32, #tpu.memory_space<vmem>>, vector<1x8xf32>
    %44 = vector.shape_cast %43 : vector<1x8xf32> to vector<1x1x8xf32>
    %45 = vector.broadcast %44 : vector<1x1x8xf32> to vector<8x16x8xf32>
    %46 = arith.mulf %42, %45 : vector<8x16x8xf32>
    %47 = arith.addf %41, %46 : vector<8x16x8xf32>
    %48 = vector.extract_strided_slice %4 {offsets = [2, 1, 0], sizes = [8, 16, 8], strides = [1, 1, 1]} : vector<10x18x8xf32> to vector<8x16x8xf32>
    %c7 = arith.constant 7 : index
    %c0_10 = arith.constant 0 : index
    %49 = vector.load %arg3[%c7, %c0_10] : memref<9x8xf32, #tpu.memory_space<vmem>>, vector<1x8xf32>
    %50 = vector.shape_cast %49 : vector<1x8xf32> to vector<1x1x8xf32>
    %51 = vector.broadcast %50 : vector<1x1x8xf32> to vector<8x16x8xf32>
    %52 = arith.mulf %48, %51 : vector<8x16x8xf32>
    %53 = arith.addf %47, %52 : vector<8x16x8xf32>
    %54 = vector.extract_strided_slice %4 {offsets = [2, 2, 0], sizes = [8, 16, 8], strides = [1, 1, 1]} : vector<10x18x8xf32> to vector<8x16x8xf32>
    %c8 = arith.constant 8 : index
    %c0_11 = arith.constant 0 : index
    %55 = vector.load %arg3[%c8, %c0_11] : memref<9x8xf32, #tpu.memory_space<vmem>>, vector<1x8xf32>
    %56 = vector.shape_cast %55 : vector<1x8xf32> to vector<1x1x8xf32>
    %57 = vector.broadcast %56 : vector<1x1x8xf32> to vector<8x16x8xf32>
    %58 = arith.mulf %54, %57 : vector<8x16x8xf32>
    %59 = arith.addf %53, %58 : vector<8x16x8xf32>
    %c0_12 = arith.constant 0 : index
    %c0_13 = arith.constant 0 : index
    %60 = vector.load %arg4[%c0_12, %c0_13] : memref<1x8xf32, #tpu.memory_space<vmem>>, vector<1x8xf32>
    %61 = vector.shape_cast %60 : vector<1x8xf32> to vector<1x1x8xf32>
    %62 = vector.broadcast %61 : vector<1x1x8xf32> to vector<8x16x8xf32>
    %63 = arith.addf %59, %62 : vector<8x16x8xf32>
    %cst_14 = arith.constant 0.000000e+00 : f32
    %64 = vector.broadcast %cst_14 : f32 to vector<8x16x8xf32>
    %65 = arith.maximumf %63, %64 : vector<8x16x8xf32>
    %66 = vector.shape_cast %65 : vector<8x16x8xf32> to vector<128x8xf32>
    %67 = arith.truncf %66 : vector<128x8xf32> to vector<128x8xbf16>
    %c0_15 = arith.constant 0 : index
    %c0_16 = arith.constant 0 : index
    %68 = vector.load %arg5[%c0_15, %c0_16] : memref<8x16xbf16, #tpu.memory_space<vmem>>, vector<8x16xbf16>
    %cst_17 = arith.constant dense<0.000000e+00> : vector<128x16xf32>
    %69 = tpu.matmul %67, %68, %cst_17 {dimension_numbers = #tpu.dot_dimension_numbers<[1], [0], [0], [1], [0, 0, 1, 1], [], []>} : vector<128x8xbf16>, vector<8x16xbf16>, vector<128x16xf32> -> vector<128x16xf32>
    %c0_18 = arith.constant 0 : index
    %c0_19 = arith.constant 0 : index
    %70 = vector.load %arg6[%c0_18, %c0_19] : memref<1x16xf32, #tpu.memory_space<vmem>>, vector<1x16xf32>
    %71 = vector.broadcast %70 : vector<1x16xf32> to vector<128x16xf32>
    %72 = arith.addf %69, %71 : vector<128x16xf32>
    %cst_20 = arith.constant 0.000000e+00 : f32
    %73 = vector.broadcast %cst_20 : f32 to vector<128x16xf32>
    %74 = arith.maximumf %72, %73 : vector<128x16xf32>
    %75 = vector.shape_cast %74 : vector<128x16xf32> to vector<8x16x16xf32>
    %c0_21 = arith.constant 0 : index
    %c0_22 = arith.constant 0 : index
    %c0_23 = arith.constant 0 : index
    %c0_24 = arith.constant 0 : index
    %76 = vector.load %arg7[%c0_21, %c0_22, %c0_23, %c0_24] : memref<1x8x16x16xf32, #tpu.memory_space<vmem>>, vector<1x8x16x16xf32>
    %77 = vector.shape_cast %76 : vector<1x8x16x16xf32> to vector<8x16x16xf32>
    %78 = vector.shape_cast %75 : vector<8x16x16xf32> to vector<1x8x16x16xf32>
    tpu.vector_store %arg7[%c0_21, %c0_22, %c0_23, %c0_24], %78 {strides = array<i32>} : memref<1x8x16x16xf32, #tpu.memory_space<vmem>>, vector<1x8x16x16xf32>,
    return
  }
  func.func @transform_0(%arg0: i32, %arg1: i32) -> (i32, i32, i32, i32) {
    %c0_i32 = arith.constant 0 : i32
    %c0_i32_0 = arith.constant 0 : i32
    %c0_i32_1 = arith.constant 0 : i32
    %c0_i32_2 = arith.constant 0 : i32
    return %arg0, %c0_i32, %c0_i32_0, %c0_i32_1 : i32, i32, i32, i32
  }
  func.func @transform_1(%arg0: i32, %arg1: i32) -> (i32, i32) {
    %c0_i32 = arith.constant 0 : i32
    %c0_i32_0 = arith.constant 0 : i32
    %c0_i32_1 = arith.constant 0 : i32
    return %c0_i32, %c0_i32_0 : i32, i32
  }
  func.func @transform_2(%arg0: i32, %arg1: i32) -> (i32, i32) {
    %c0_i32 = arith.constant 0 : i32
    %c0_i32_0 = arith.constant 0 : i32
    %c0_i32_1 = arith.constant 0 : i32
    return %c0_i32, %c0_i32_0 : i32, i32
  }
  func.func @transform_3(%arg0: i32, %arg1: i32) -> (i32, i32) {
    %c0_i32 = arith.constant 0 : i32
    %c0_i32_0 = arith.constant 0 : i32
    %c0_i32_1 = arith.constant 0 : i32
    return %c0_i32, %c0_i32_0 : i32, i32
  }
  func.func @transform_4(%arg0: i32, %arg1: i32) -> (i32, i32) {
    %c0_i32 = arith.constant 0 : i32
    %c0_i32_0 = arith.constant 0 : i32
    %c0_i32_1 = arith.constant 0 : i32
    return %c0_i32, %c0_i32_0 : i32, i32
  }
  func.func @transform_5(%arg0: i32, %arg1: i32) -> (i32, i32, i32, i32) {
    %c0_i32 = arith.constant 0 : i32
    %c0_i32_0 = arith.constant 0 : i32
    %c0_i32_1 = arith.constant 0 : i32
    return %arg0, %arg1, %c0_i32, %c0_i32_0 : i32, i32, i32, i32
  }
}

</mosaic_0001>

<bundles_post_ra>
// kernel: tpu_custom_call.1
= control target key start
LH: loop header
LB: loop body
LE: loop exit
PB: predicated region body
PF: predicated region fallthrough
CT: control target
= control target key end

     0   :  { %s2426_s0 = inlined_call_operand.vmem [shape: f32[2,18,18,8], index: 0, kind: input, shape index: {}]   ;;  %s2427_s1 = inlined_call_operand.vmem [shape: f32[9,8], index: 1, kind: input, shape index: {}]   ;;  %s2428_s2 = inlined_call_operand.vmem [shape: f32[1,8], index: 2, kind: input, shape index: {}]   ;;  %s2429_s3 = inlined_call_operand.vmem [shape: bf16[8,16], index: 3, kind: input, shape index: {}]   ;;  %s2430_s4 = inlined_call_operand.vmem [shape: f32[1,16], index: 4, kind: input, shape index: {}]   ;;  %s2431_s5 = inlined_call_operand.hbm [shape: f32[2,16,16,16], index: 5, kind: output, shape index: {}]  }
   0x1   :  { %2432 = sst [smem:[#allocation5_spill]] %s2429_s3 }
   0x2   :  { %10 = vsyncpa [#allocation3], 0 }
   0x3   :  { %12 = vsyncpa [#allocation3 + $0x1], 0  ;;  %s1616_s18 = smov 0   ;;  %s1618_s19 = smov 0  }
   0x4   :  { %s1620_s20 = smov 0   ;;  %s1622_s21 = smov 0  }
   0x5   :  { %s1624_s22 = smov 0   ;;  %s1626_s23 = smov 0  }
   0x6   :  { %s1628_s24 = smov 0   ;;  %s1630_s25 = smov 0  }
   0x7 LB: > { %s1365_s26 = sadd.s32 4294967295, %s1582_s25   ;;  %s1366_s27 = sadd.s32 4294967294, %s1582_s25   ;;  %s1582_s25 = sphi %s1630_s25, %s18_s25   ;;  %s1578_s24 = sphi %s1628_s24, %s2442_s24   ;;  %s1574_s23 = sphi %s1626_s23, %s2441_s23   ;;  %s1570_s22 = sphi %s1624_s22, %s2440_s22   ;;  %s1566_s21 = sphi %s1622_s21, %s2439_s21   ;;  %s1562_s20 = sphi %s1620_s20, %s2438_s20   ;;  %s1558_s19 = sphi %s1618_s19, %s2437_s19   ;;  %s1554_s18 = sphi %s1616_s18, %s2436_s18  }
   0x8   : > { %s27_s28 = sadd.s32 1, %s1574_s23  ;;  %s30_s29 = sadd.s32 1, %s1578_s24 }
   0x9   : > { %p28_p0 = scmp.ge.s32.totalorder %s27_s28, 2  ;;  %p159_p1 = scmp.ne.s32.totalorder %s1562_s20, %s1558_s19 }
   0xa   : > { %p160_p2 = scmp.eq.s32.totalorder %s1365_s26, 3  ;;  %p165_p5 = scmp.ne.s32.totalorder %s1558_s19, %s1554_s18 }
   0xb   : > { %s2444_s28 = smov (%p28_p0, %s27_s28), 0  ;;  %s2446_s29 = smov (!%p28_p0, %s30_s29), %s1578_s24 }
   0xc   : > { %s145_s30 = ssub.s32 %s1574_s23, %s2444_s28  ;;  %p1667_p3 = por %p160_p2, %p159_p1 }
   0xd   : > { %p32_p4 = scmp.ge.s32.totalorder %s2446_s29, 2  ;;  %p166_p6 = scmp.eq.s32.totalorder %s1366_s27, 3 }
   0xe   : > { %p1369_p7 = scmp.ge.s32.totalorder %s1582_s25, 1  ;;  %p204_p9 = scmp.lt.s32.totalorder %s1582_s25, 5 }
   0xf   : > { %s2448_s29 = smov (%p32_p4, %s2446_s29), 0  ;;  %p1676_p8 = por %p166_p6, %p165_p5 }
  0x10   : > { %s144_s8 = ssub.s32 %s1578_s24, %s2448_s29  ;;  %s149_s9 = sadd.s32 1, %s1562_s20 }
  0x11   : > { %s146_s10 = sor.u32 %s145_s30, %s144_s8  ;;  %p205_p10 = pnand %p1369_p7, %p204_p9 }
  0x12   : > { %p147_p11 = scmp.eq.s32.totalorder %s146_s10, 0  ;;  %s2435_s3 = sld [smem:[#allocation5_spill]] (!%p205_p10) }
  0x13   : > { %208 = sbr.rel (%p205_p10) target bundleno = 337 (0x151), region = 40  ;;  %p232_p12 = scmp.lt.s32.totalorder (!%p205_p10), %s1570_s22, 1 }
  0x14   : > { %s1685_s11 = scalar_select %p147_p11, %s1562_s20, %s149_s9  }
  0x15   : > { %s1373_s15 = smul.u32 (!%p205_p10), 192, %s1566_s21  ;;  %s229_s30 = sand.u32 (!%p205_p10), 1, %s1558_s19  }
  0x16   : > { %s1370_s13 = sshll.u32 (!%p205_p10), %s229_s30, 7 }
  0x17   : > { %s2331_s17 = scalar_lea.vmem (!%p205_p10), [#allocation2], %s1370_s13 }
  0x18   : > { %v1152_v0 = vld [vmem:[%s2435_s3] sm:$0xf]  ;;  %vm1182_vm0 = vcmask 1043456   ;;  %s233_s14 = scalar_select %p232_p12, %s1570_s22, 1  ;;  %vm356_vm1 = vcmask 1046528   ;;  %vm479_vm2 = vcmask 1045504  }
  0x19   : > { %v1184_v1 = vsel %vm1182_vm0, %v1152_v0, 0  ;;  %v1696_v2 = vld [vmem:[%s2427_s1] ss:$0 sm:$0xff]  ;;  %v1701_v3 = vld [vmem:[%s2427_s1 + $0x1] ss:$0 sm:$0xff]  ;;  %vm1157_vm3 = vcmask 64512  }
  0x1a   : > { %1193 = vmatpush.bf16.msra.mxu0 %v1184_v1  ;;  %1390 = vmatpush.bf16.msra.mxu1 %v1184_v1  ;;  %s1393_s16 = smul.u32 432, %s233_s14  ;;  %v1709_v4 = vld [vmem:[%s2427_s1 + $0x2] ss:$0 sm:$0xff]  ;;  %v1716_v5 = vld [vmem:[%s2427_s1 + $0x3] ss:$0 sm:$0xff]  ;;  %vm1251_vm4 = vcmask 130048  }
  0x1b   : > { %1391 = vmatpush.bf16.msra.mxu2 %v1184_v1  ;;  %1392 = vmatpush.bf16.msra.mxu3 %v1184_v1  ;;  %v1734_v15 = vld [vmem:[%s2427_s1 + $0x4] ss:$0 sm:$0xff]  ;;  %v1750_v29 = vld [vmem:[%s2427_s1 + $0x5] ss:$0 sm:$0xff]  ;;  %v1762_v34 = vld [vmem:[%s2427_s1 + $0x6] ss:$0 sm:$0xff] }
  0x1c   : > { %s236_s10 = scalar_lea.vmem %s2426_s0, %s1393_s16  ;;  %v1770_v43 = vld [vmem:[%s2427_s1 + $0x7] ss:$0 sm:$0xff]  ;;  %v1788_v53 = vld [vmem:[%s2427_s1 + $0x8] ss:$0 sm:$0xff]  ;;  %s1389_s3 = sshll.u32 %s1566_s21, 4 }
  0x1d   : > { %s1711_s14 = scalar_lea.vmem %s236_s10, %s1373_s15  ;;  %s1385_s15 = sshll.u32 %s1570_s22, 5 }
  0x1e   : > { %v242_v6 = vld [vmem:[%s1711_s14] sm:$0xff]  ;;  %v243_v7 = vld [vmem:[%s1711_s14 + $0x8] sm:$0xff]  ;;  %v244_v8 = vld [vmem:[%s1711_s14 + $0x10] sm:$0x3]  ;;  %s1281_s16 = sadd.s32 %s1389_s3, %s1385_s15  ;;  %s1284_s9 = sshll.u32 %s2331_s17, 4  ;;  %s1285_s9 = int_to_ptr.vmem [resolvable:$true] %s1284_s9 }
  0x1f   : > { %v1722_v9 = vld [vmem:[%s1711_s14 + $0x18] sm:$0xff]  ;;  %v1725_v10 = vld [vmem:[%s1711_s14 + $0x20] sm:$0xff]  ;;  %v274_v11 = vmul.f32 %v1696_v2, %v242_v6  ;;  %v275_v12 = vmul.f32 %v1696_v2, %v243_v7  ;;  %v308_v13 = vmul.f32 %v1701_v3, %v242_v6  ;;  %v309_v14 = vmul.f32 %v1701_v3, %v243_v7  ;;  %v1737_v16 = vld [vmem:[%s1711_s14 + $0x28] sm:$0x3]  ;;  %s1386_s26 = sshll.u32 %s1281_s16, 3  ;;  %s1269_s21 = scalar_lea.sflag [#allocation3], %s229_s30 }
  0x20   : > { %v310_v17 = vmul.f32 %v1701_v3, %v244_v8  ;;  %v431_v18 = vmul.f32 %v1709_v4, %v242_v6  ;;  %v432_v19 = vmul.f32 %v1709_v4, %v243_v7  ;;  %v433_v20 = vmul.f32 %v1709_v4, %v244_v8  ;;  %v1773_v44 = vld [vmem:[%s1711_s14 + $0x30] sm:$0xff]  ;;  %v1791_v54 = vld [vmem:[%s1711_s14 + $0x38] sm:$0xff]  ;;  %v1794_v59 = vld [vmem:[%s1711_s14 + $0x40] sm:$0x3]  ;;  %s1283_s8 = scalar_lea.hbm %s2431_s5, %s1386_s26  ;;  %s1508_s15 = scalar_lea.hbm %s2431_s5, 512 }
  0x21   : > { %v357_v21 = vrot.slane %v308_v13, 1  ;;  %v358_v22 = vrot.slane %v309_v14, 1  ;;  %v554_v23 = vmul.f32 %v1716_v5, %v1722_v9  ;;  %v555_v24 = vmul.f32 %v1716_v5, %v1725_v10  ;;  %s1286_s10 = sshll.u32 %s1283_s8, 4  ;;  %s1287_s10 = int_to_ptr.hbm [resolvable:$true] %s1286_s10 }
  0x22   : > { %v360_v25 = vrot.slane %v310_v17, 1  ;;  %v480_v26 = vrot.slane %v431_v18, 2  ;;  %v481_v27 = vrot.slane %v432_v19, 2  ;;  %v483_v28 = vrot.slane %v433_v20, 2  ;;  %s1502_s22 = sshra.s32 %s1287_s10, 4  ;;  %s1503_s22 = int_to_ptr.hbm [resolvable:$true] %s1502_s22 }
  0x23   : > { %v359_v30 = vsel %vm356_vm1, %v357_v21, %v358_v22  ;;  %v588_v31 = vmul.f32 %v1734_v15, %v1722_v9  ;;  %v589_v32 = vmul.f32 %v1734_v15, %v1725_v10  ;;  %v590_v33 = vmul.f32 %v1734_v15, %v1737_v16  ;;  %s1504_s12 = scalar_lea.hbm %s1503_s22, 128  ;;  %p1509_p2 = scmp.lt.s32.totalorder %s1503_s22, %s2431_s5 }
  0x24   : > { %v361_v35 = vsel %vm356_vm1, %v358_v22, %v360_v25  ;;  %v413_v36 = vadd.f32 %v359_v30, %v274_v11  ;;  %v482_v37 = vsel %vm479_vm2, %v480_v26, %v481_v27  ;;  %v484_v38 = vsel %vm479_vm2, %v481_v27, %v483_v28  ;;  %p1505_p13 = scmp.ne.s32.totalorder %s1503_s22, %s1504_s12  ;;  %p1510_p4 = scmp.lt.s32.totalorder %s1508_s15, %s1504_s12 }
  0x25   : > { %v414_v39 = vadd.f32 %v361_v35, %v275_v12  ;;  %v636_v40 = vrot.slane %v588_v31, 1  ;;  %v637_v41 = vrot.slane %v589_v32, 1  ;;  %v639_v42 = vrot.slane %v590_v33, 1 }
  0x26   : > { %v536_v45 = vadd.f32 %v482_v37, %v413_v36  ;;  %v710_v46 = vmul.f32 %v1750_v29, %v1722_v9  ;;  %v711_v47 = vmul.f32 %v1750_v29, %v1725_v10  ;;  %v712_v48 = vmul.f32 %v1750_v29, %v1737_v16  ;;  %v1827_v37 = vld [vmem:[%s2428_s2] ss:$0 sm:$0xff]  ;;  %p1506_p0 = pnand %p1505_p13, %p1667_p3  ;;  %p1511_p5 = por %p1510_p4, %p1509_p2 }
  0x27   : > { %v537_v49 = vadd.f32 %v484_v38, %v414_v39  ;;  %v638_v50 = vsel %vm356_vm1, %v636_v40, %v637_v41  ;;  %v640_v51 = vsel %vm356_vm1, %v637_v41, %v639_v42  ;;  %v832_v52 = vmul.f32 %v1762_v34, %v1773_v44  ;;  %v1830_v38 = vld [vmem:[%s1711_s14 + $0x48] sm:$0xff] }
  0x28   : > { %v570_v55 = vadd.f32 %v554_v23, %v536_v45  ;;  %v758_v56 = vrot.slane %v710_v46, 2  ;;  %v759_v57 = vrot.slane %v711_v47, 2  ;;  %v761_v58 = vrot.slane %v712_v48, 2  ;;  %v1837_v47 = vld [vmem:[%s1711_s14 + $0x50] sm:$0xff]  ;;  %p1507_p1 = pneg %p1506_p0 }
  0x29   : > { %v571_v60 = vadd.f32 %v555_v24, %v537_v49  ;;  %v833_v61 = vmul.f32 %v1762_v34, %v1791_v54  ;;  %v866_v62 = vmul.f32 %v1770_v43, %v1773_v44  ;;  %v867_v63 = vmul.f32 %v1770_v43, %v1791_v54 }
  0x2a   : > { %v692_v0 = vadd.f32 %v638_v50, %v570_v55  ;;  %v760_v1 = vsel %vm479_vm2, %v758_v56, %v759_v57  ;;  %v762_v6 = vsel %vm479_vm2, %v759_v57, %v761_v58  ;;  %v868_v7 = vmul.f32 %v1770_v43, %v1794_v59  ;;  %v1848_v58 = vld [vmem:[%s1711_s14 + $0x58] sm:$0x3]  ;;  %p1512_p6 = pnand %p1511_p5, %p1507_p1 }
  0x2b   : > { %v693_v8 = vadd.f32 %v640_v51, %v571_v60  ;;  %v914_v11 = vrot.slane %v866_v62, 1  ;;  %v915_v12 = vrot.slane %v867_v63, 1  ;;  %v988_v13 = vmul.f32 %v1788_v53, %v1773_v44 }
  0x2c   : > { %v814_v14 = vadd.f32 %v760_v1, %v692_v0  ;;  %v917_v17 = vrot.slane %v868_v7, 1  ;;  %v989_v18 = vmul.f32 %v1788_v53, %v1791_v54  ;;  %v990_v19 = vmul.f32 %v1788_v53, %v1794_v59 }
  0x2d   : > { %v815_v20 = vadd.f32 %v762_v6, %v693_v8  ;;  %v916_v21 = vsel %vm356_vm1, %v914_v11, %v915_v12  ;;  %v1036_v22 = vrot.slane %v988_v13, 2  ;;  %v278_v23 = vmul.f32 %v1696_v2, %v1773_v44 }
  0x2e   : > { %v848_v24 = vadd.f32 %v832_v52, %v814_v14  ;;  %v918_v25 = vsel %vm356_vm1, %v915_v12, %v917_v17  ;;  %v1037_v26 = vrot.slane %v989_v18, 2  ;;  %v1039_v27 = vrot.slane %v990_v19, 2 }
  0x2f   : > { %v849_v28 = vadd.f32 %v833_v61, %v815_v20  ;;  %v279_v30 = vmul.f32 %v1696_v2, %v1791_v54  ;;  %v314_v31 = vmul.f32 %v1701_v3, %v1773_v44  ;;  %v315_v32 = vmul.f32 %v1701_v3, %v1791_v54 }
  0x30   : > { %v970_v33 = vadd.f32 %v916_v21, %v848_v24  ;;  %v1038_v35 = vsel %vm479_vm2, %v1036_v22, %v1037_v26  ;;  %v1040_v36 = vsel %vm479_vm2, %v1037_v26, %v1039_v27  ;;  %v316_v39 = vmul.f32 %v1701_v3, %v1794_v59  ;;  %v1867_v27 = vld [vmem:[%s1711_s14 + $0x60] sm:$0xff] }
  0x31   : > { %v971_v40 = vadd.f32 %v918_v25, %v849_v28  ;;  %v367_v41 = vrot.slane %v314_v31, 1  ;;  %v368_v42 = vrot.slane %v315_v32, 1  ;;  %v437_v45 = vmul.f32 %v1709_v4, %v1773_v44 }
  0x32   : > { %v1092_v46 = vadd.f32 %v1038_v35, %v970_v33  ;;  %v370_v48 = vrot.slane %v316_v39, 1  ;;  %v438_v49 = vmul.f32 %v1709_v4, %v1791_v54  ;;  %v439_v50 = vmul.f32 %v1709_v4, %v1794_v59  ;;  %v1874_v33 = vld [vmem:[%s1711_s14 + $0x68] sm:$0xff] }
  0x33   : > { %v1093_v51 = vadd.f32 %v1040_v36, %v971_v40  ;;  %v369_v52 = vsel %vm356_vm1, %v367_v41, %v368_v42  ;;  %v490_v55 = vrot.slane %v437_v45, 2  ;;  %v558_v56 = vmul.f32 %v1716_v5, %v1830_v38  ;;  %v1880_v41 = vld [vmem:[%s1711_s14 + $0x70] sm:$0x3] }
  0x34   : > { %v1112_v57 = vadd.f32 %v1827_v37, %v1092_v46  ;;  %v371_v60 = vsel %vm356_vm1, %v368_v42, %v370_v48  ;;  %v417_v61 = vadd.f32 %v369_v52, %v278_v23  ;;  %v491_v62 = vrot.slane %v438_v49, 2 }
  0x35   : > { %v1113_v63 = vadd.f32 %v1827_v37, %v1093_v51  ;;  %v418_v0 = vadd.f32 %v371_v60, %v279_v30  ;;  %v493_v1 = vrot.slane %v439_v50, 2  ;;  %v559_v6 = vmul.f32 %v1716_v5, %v1837_v47 }
  0x36   : > { %v1128_v7 = vmax.f32 %v1112_v57, 0.0  ;;  %v492_v8 = vsel %vm479_vm2, %v490_v55, %v491_v62  ;;  %v594_v11 = vmul.f32 %v1734_v15, %v1830_v38  ;;  %v595_v12 = vmul.f32 %v1734_v15, %v1837_v47 }
  0x37   : > { %v1129_v13 = vmax.f32 %v1113_v63, 0.0  ;;  %v494_v14 = vsel %vm479_vm2, %v491_v62, %v493_v1  ;;  %v540_v17 = vadd.f32 %v492_v8, %v417_v61  ;;  %v596_v18 = vmul.f32 %v1734_v15, %v1848_v58 }
  0x38   : > { %v541_v19 = vadd.f32 %v494_v14, %v418_v0  ;;  %v646_v20 = vrot.slane %v594_v11, 1  ;;  %v647_v21 = vrot.slane %v595_v12, 1  ;;  %v716_v22 = vmul.f32 %v1750_v29, %v1830_v38 }
  0x39   : > { %v1144_v23 = vpack.c.bf16 %v1129_v13, %v1128_v7  ;;  %v574_v24 = vadd.f32 %v558_v56, %v540_v17  ;;  %v649_v25 = vrot.slane %v596_v18, 1  ;;  %v717_v26 = vmul.f32 %v1750_v29, %v1837_v47 }
  0x3a   : > { %v575_v28 = vadd.f32 %v559_v6, %v541_v19  ;;  %v648_v30 = vsel %vm356_vm1, %v646_v20, %v647_v21  ;;  %v718_v31 = vmul.f32 %v1750_v29, %v1848_v58  ;;  %v768_v32 = vrot.slane %v716_v22, 2 }
  0x3b   : > { %1374 = vmatmul.msk.bf16.vlgmr.msra.gmra.mxu0 %vm1157_vm3, %v1144_v23  ;;  %v650_v35 = vsel %vm356_vm1, %v647_v21, %v649_v25  ;;  %v696_v36 = vadd.f32 %v648_v30, %v574_v24  ;;  %v769_v39 = vrot.slane %v717_v26, 2  ;;  %v836_v40 = vmul.f32 %v1762_v34, %v1867_v27  ;;  %v1909_v23 = vld [vmem:[%s1711_s14 + $0x78] sm:$0xff] }
  0x3c   : > { %v697_v42 = vadd.f32 %v650_v35, %v575_v28  ;;  %v771_v45 = vrot.slane %v718_v31, 2  ;;  %v837_v46 = vmul.f32 %v1762_v34, %v1874_v33  ;;  %v872_v48 = vmul.f32 %v1770_v43, %v1867_v27 }
  0x3d   : > { %v770_v49 = vsel %vm479_vm2, %v768_v32, %v769_v39  ;;  %v873_v50 = vmul.f32 %v1770_v43, %v1874_v33  ;;  %v874_v51 = vmul.f32 %v1770_v43, %v1880_v41  ;;  %v994_v52 = vmul.f32 %v1788_v53, %v1867_v27 }
  0x3e   : > { %v772_v55 = vsel %vm479_vm2, %v769_v39, %v771_v45  ;;  %v818_v56 = vadd.f32 %v770_v49, %v696_v36  ;;  %v924_v57 = vrot.slane %v872_v48, 1  ;;  %v995_v60 = vmul.f32 %v1788_v53, %v1874_v33 }
  0x3f   : > { %v819_v61 = vadd.f32 %v772_v55, %v697_v42  ;;  %v925_v62 = vrot.slane %v873_v50, 1  ;;  %v927_v63 = vrot.slane %v874_v51, 1  ;;  %v996_v0 = vmul.f32 %v1788_v53, %v1880_v41  ;;  %v1923_v42 = vld [vmem:[%s1711_s14 + $0x80] sm:$0xff]  ;;  %v1929_v50 = vld [vmem:[%s1711_s14 + $0x88] sm:$0x3] }
  0x40   : > { %v852_v1 = vadd.f32 %v836_v40, %v818_v56  ;;  %v1046_v6 = vrot.slane %v994_v52, 2  ;;  %v1047_v7 = vrot.slane %v995_v60, 2  ;;  %v282_v8 = vmul.f32 %v1696_v2, %v1867_v27 }
  0x41   : > { %v853_v11 = vadd.f32 %v837_v46, %v819_v61  ;;  %v926_v12 = vsel %vm356_vm1, %v924_v57, %v925_v62  ;;  %v928_v13 = vsel %vm356_vm1, %v925_v62, %v927_v63  ;;  %v1049_v14 = vrot.slane %v996_v0, 2 }
  0x42   : > { %v974_v17 = vadd.f32 %v926_v12, %v852_v1  ;;  %v1048_v18 = vsel %vm479_vm2, %v1046_v6, %v1047_v7  ;;  %v283_v19 = vmul.f32 %v1696_v2, %v1874_v33  ;;  %v320_v20 = vmul.f32 %v1701_v3, %v1867_v27 }
  0x43   : > { %v975_v21 = vadd.f32 %v928_v13, %v853_v11  ;;  %v1050_v22 = vsel %vm479_vm2, %v1047_v7, %v1049_v14  ;;  %v321_v24 = vmul.f32 %v1701_v3, %v1874_v33  ;;  %v322_v25 = vmul.f32 %v1701_v3, %v1880_v41 }
  0x44   : > { %v1096_v26 = vadd.f32 %v1048_v18, %v974_v17  ;;  %v377_v28 = vrot.slane %v320_v20, 1  ;;  %v443_v30 = vmul.f32 %v1709_v4, %v1867_v27  ;;  %v444_v31 = vmul.f32 %v1709_v4, %v1874_v33  ;;  %v1948_v18 = vld [vmem:[%s1711_s14 + $0x90] sm:$0xff] }
  0x45   : > { %v1097_v32 = vadd.f32 %v1050_v22, %v975_v21  ;;  %v378_v35 = vrot.slane %v321_v24, 1  ;;  %v380_v36 = vrot.slane %v322_v25, 1  ;;  %v445_v39 = vmul.f32 %v1709_v4, %v1880_v41  ;;  %v1952_v24 = vld [vmem:[%s1711_s14 + $0x98] sm:$0xff] }
  0x46   : > { %v1116_v40 = vadd.f32 %v1827_v37, %v1096_v26  ;;  %v500_v45 = vrot.slane %v443_v30, 2  ;;  %v501_v46 = vrot.slane %v444_v31, 2  ;;  %v562_v48 = vmul.f32 %v1716_v5, %v1909_v23 }
  0x47   : > { %v1117_v49 = vadd.f32 %v1827_v37, %v1097_v32  ;;  %v379_v51 = vsel %vm356_vm1, %v377_v28, %v378_v35  ;;  %v381_v52 = vsel %vm356_vm1, %v378_v35, %v380_v36  ;;  %v503_v55 = vrot.slane %v445_v39, 2  ;;  %v1965_v39 = vld [vmem:[%s1711_s14 + $0xa0] sm:$0x3] }
  0x48   : > { %v1132_v56 = vmax.f32 %v1116_v40, 0.0  ;;  %v421_v57 = vadd.f32 %v379_v51, %v282_v8  ;;  %v422_v60 = vadd.f32 %v381_v52, %v283_v19  ;;  %v502_v61 = vsel %vm479_vm2, %v500_v45, %v501_v46 }
  0x49   : > { %v1133_v62 = vmax.f32 %v1117_v49, 0.0  ;;  %v504_v63 = vsel %vm479_vm2, %v501_v46, %v503_v55  ;;  %v563_v0 = vmul.f32 %v1716_v5, %v1923_v42  ;;  %v600_v1 = vmul.f32 %v1734_v15, %v1909_v23 }
  0x4a   : > { %v544_v6 = vadd.f32 %v502_v61, %v421_v57  ;;  %v545_v7 = vadd.f32 %v504_v63, %v422_v60  ;;  %v601_v11 = vmul.f32 %v1734_v15, %v1923_v42  ;;  %v602_v8 = vmul.f32 %v1734_v15, %v1929_v50 }
  0x4b   : > { %v1146_v12 = vpack.c.bf16 %v1133_v62, %v1132_v56  ;;  %v656_v13 = vrot.slane %v600_v1, 1  ;;  %v722_v14 = vmul.f32 %v1750_v29, %v1909_v23  ;;  %v723_v17 = vmul.f32 %v1750_v29, %v1923_v42 }
  0x4c   : > { %v578_v19 = vadd.f32 %v562_v48, %v544_v6  ;;  %v579_v20 = vadd.f32 %v563_v0, %v545_v7  ;;  %v657_v21 = vrot.slane %v601_v11, 1  ;;  %v659_v22 = vrot.slane %v602_v8, 1 }
  0x4d   : > { %1376 = vmatmul.msk.bf16.vlgmr.msra.gmra.mxu1 %vm1157_vm3, %v1146_v12  ;;  %v724_v25 = vmul.f32 %v1750_v29, %v1929_v50  ;;  %v778_v26 = vrot.slane %v722_v14, 2  ;;  %v779_v28 = vrot.slane %v723_v17, 2  ;;  %v840_v30 = vmul.f32 %v1762_v34, %v1948_v18 }
  0x4e   : > { %v658_v31 = vsel %vm356_vm1, %v656_v13, %v657_v21  ;;  %v660_v32 = vsel %vm356_vm1, %v657_v21, %v659_v22  ;;  %v841_v35 = vmul.f32 %v1762_v34, %v1952_v24  ;;  %v878_v36 = vmul.f32 %v1770_v43, %v1948_v18 }
  0x4f   : > { %v700_v40 = vadd.f32 %v658_v31, %v578_v19  ;;  %v701_v45 = vadd.f32 %v660_v32, %v579_v20  ;;  %v780_v46 = vsel %vm479_vm2, %v778_v26, %v779_v28  ;;  %v781_v48 = vrot.slane %v724_v25, 2  ;;  %v1990_v26 = vld [vmem:[%s1711_s14 + $0xa8] sm:$0xff] }
  0x50   : > { %v879_v49 = vmul.f32 %v1770_v43, %v1952_v24  ;;  %v880_v51 = vmul.f32 %v1770_v43, %v1965_v39  ;;  %v934_v52 = vrot.slane %v878_v36, 1  ;;  %v1000_v55 = vmul.f32 %v1788_v53, %v1948_v18 }
  0x51   : > { %v782_v56 = vsel %vm479_vm2, %v779_v28, %v781_v48  ;;  %v822_v57 = vadd.f32 %v780_v46, %v700_v40  ;;  %v1001_v60 = vmul.f32 %v1788_v53, %v1952_v24  ;;  %v1002_v61 = vmul.f32 %v1788_v53, %v1965_v39 }
  0x52   : > { %v823_v62 = vadd.f32 %v782_v56, %v701_v45  ;;  %v935_v63 = vrot.slane %v879_v49, 1  ;;  %v937_v0 = vrot.slane %v880_v51, 1  ;;  %v1056_v1 = vrot.slane %v1000_v55, 2 }
  0x53   : > { %v856_v6 = vadd.f32 %v840_v30, %v822_v57  ;;  %v1057_v7 = vrot.slane %v1001_v60, 2  ;;  %v1059_v11 = vrot.slane %v1002_v61, 2  ;;  %v286_v8 = vmul.f32 %v1696_v2, %v1948_v18  ;;  %v2010_v61 = vld [vmem:[%s1711_s14 + $0xb8] sm:$0x3] }
  0x54   : > { %v857_v12 = vadd.f32 %v841_v35, %v823_v62  ;;  %v936_v13 = vsel %vm356_vm1, %v934_v52, %v935_v63  ;;  %v938_v14 = vsel %vm356_vm1, %v935_v63, %v937_v0  ;;  %v287_v17 = vmul.f32 %v1696_v2, %v1952_v24  ;;  %v1999_v35 = vld [vmem:[%s1711_s14 + $0xb0] sm:$0xff] }
  0x55   : > { %v978_v19 = vadd.f32 %v936_v13, %v856_v6  ;;  %v1058_v20 = vsel %vm479_vm2, %v1056_v1, %v1057_v7  ;;  %v1060_v21 = vsel %vm479_vm2, %v1057_v7, %v1059_v11  ;;  %v326_v22 = vmul.f32 %v1701_v3, %v1948_v18 }
  0x56   : > { %v979_v25 = vadd.f32 %v938_v14, %v857_v12  ;;  %v327_v28 = vmul.f32 %v1701_v3, %v1952_v24  ;;  %v328_v30 = vmul.f32 %v1701_v3, %v1965_v39  ;;  %v449_v31 = vmul.f32 %v1709_v4, %v1948_v18 }
  0x57   : > { %v1100_v32 = vadd.f32 %v1058_v20, %v978_v19  ;;  %v387_v36 = vrot.slane %v326_v22, 1  ;;  %v450_v40 = vmul.f32 %v1709_v4, %v1952_v24  ;;  %v451_v45 = vmul.f32 %v1709_v4, %v1965_v39  ;;  %v2023_v20 = vld [vmem:[%s1711_s14 + $0xc0] sm:$0xff] }
  0x58   : > { %v1101_v46 = vadd.f32 %v1060_v21, %v979_v25  ;;  %v388_v48 = vrot.slane %v327_v28, 1  ;;  %v390_v49 = vrot.slane %v328_v30, 1  ;;  %v510_v51 = vrot.slane %v449_v31, 2  ;;  %v2030_v28 = vld [vmem:[%s1711_s14 + $0xc8] sm:$0xff] }
  0x59   : > { %v1120_v52 = vadd.f32 %v1827_v37, %v1100_v32  ;;  %v511_v55 = vrot.slane %v450_v40, 2  ;;  %v513_v56 = vrot.slane %v451_v45, 2  ;;  %v566_v57 = vmul.f32 %v1716_v5, %v1990_v26 }
  0x5a   : > { %v1121_v60 = vadd.f32 %v1827_v37, %v1101_v46  ;;  %v389_v62 = vsel %vm356_vm1, %v387_v36, %v388_v48  ;;  %v391_v63 = vsel %vm356_vm1, %v388_v48, %v390_v49  ;;  %v567_v0 = vmul.f32 %v1716_v5, %v1999_v35  ;;  %v2038_v48 = vld [vmem:[%s1711_s14 + $0xd0] sm:$0x3] }
  0x5b   : > { %v1136_v1 = vmax.f32 %v1120_v52, 0.0  ;;  %v425_v6 = vadd.f32 %v389_v62, %v286_v8  ;;  %v426_v7 = vadd.f32 %v391_v63, %v287_v17  ;;  %v512_v11 = vsel %vm479_vm2, %v510_v51, %v511_v55 }
  0x5c   : > { %v1137_v12 = vmax.f32 %v1121_v60, 0.0  ;;  %v514_v13 = vsel %vm479_vm2, %v511_v55, %v513_v56  ;;  %v606_v14 = vmul.f32 %v1734_v15, %v1990_v26  ;;  %v607_v19 = vmul.f32 %v1734_v15, %v1999_v35 }
  0x5d   : > { %v548_v21 = vadd.f32 %v512_v11, %v425_v6  ;;  %v549_v22 = vadd.f32 %v514_v13, %v426_v7  ;;  %v608_v8 = vmul.f32 %v1734_v15, %v2010_v61  ;;  %v728_v17 = vmul.f32 %v1750_v29, %v1990_v26 }
  0x5e   : > { %v1148_v25 = vpack.c.bf16 %v1137_v12, %v1136_v1  ;;  %v666_v30 = vrot.slane %v606_v14, 1  ;;  %v667_v31 = vrot.slane %v607_v19, 1  ;;  %v729_v32 = vmul.f32 %v1750_v29, %v1999_v35 }
  0x5f   : > { %v582_v36 = vadd.f32 %v566_v57, %v548_v21  ;;  %v583_v40 = vadd.f32 %v567_v0, %v549_v22  ;;  %v669_v45 = vrot.slane %v608_v8, 1  ;;  %v730_v46 = vmul.f32 %v1750_v29, %v2010_v61 }
  0x60   : > { %1378 = vmatmul.msk.bf16.vlgmr.msra.gmra.mxu2 %vm1157_vm3, %v1148_v25  ;;  %v668_v49 = vsel %vm356_vm1, %v666_v30, %v667_v31  ;;  %v788_v51 = vrot.slane %v728_v17, 2  ;;  %v789_v52 = vrot.slane %v729_v32, 2  ;;  %v844_v55 = vmul.f32 %v1762_v34, %v2023_v20 }
  0x61   : > { %v670_v56 = vsel %vm356_vm1, %v667_v31, %v669_v45  ;;  %v704_v60 = vadd.f32 %v668_v49, %v582_v36  ;;  %v791_v57 = vrot.slane %v730_v46, 2  ;;  %v845_v62 = vmul.f32 %v1762_v34, %v2030_v28 }
  0x62   : > { %v705_v63 = vadd.f32 %v670_v56, %v583_v40  ;;  %v790_v0 = vsel %vm479_vm2, %v788_v51, %v789_v52  ;;  %v884_v1 = vmul.f32 %v1770_v43, %v2023_v20  ;;  %v885_v6 = vmul.f32 %v1770_v43, %v2030_v28 }
  0x63   : > { %v792_v7 = vsel %vm479_vm2, %v789_v52, %v791_v57  ;;  %v826_v11 = vadd.f32 %v790_v0, %v704_v60  ;;  %v886_v12 = vmul.f32 %v1770_v43, %v2038_v48  ;;  %v1006_v13 = vmul.f32 %v1788_v53, %v2023_v20 }
  0x64   : > { %v827_v14 = vadd.f32 %v792_v7, %v705_v63  ;;  %v944_v19 = vrot.slane %v884_v1, 1  ;;  %v945_v21 = vrot.slane %v885_v6, 1  ;;  %v1007_v22 = vmul.f32 %v1788_v53, %v2030_v28 }
  0x65   : > { %v860_v8 = vadd.f32 %v844_v55, %v826_v11  ;;  %v947_v17 = vrot.slane %v886_v12, 1  ;;  %v1008_v25 = vmul.f32 %v1788_v53, %v2038_v48  ;;  %v1066_v30 = vrot.slane %v1006_v13, 2 }
  0x66   : > { %v861_v31 = vadd.f32 %v845_v62, %v827_v14  ;;  %v946_v32 = vsel %vm356_vm1, %v944_v19, %v945_v21  ;;  %v1067_v36 = vrot.slane %v1007_v22, 2  ;;  %v276_v40 = vmul.f32 %v1696_v2, %v1722_v9 }
  0x67   : > { %v948_v45 = vsel %vm356_vm1, %v945_v21, %v947_v17  ;;  %v982_v46 = vadd.f32 %v946_v32, %v860_v8  ;;  %v1069_v49 = vrot.slane %v1008_v25, 2  ;;  %v277_v51 = vmul.f32 %v1696_v2, %v1725_v10 }
  0x68   : > { %v983_v52 = vadd.f32 %v948_v45, %v861_v31  ;;  %v1068_v55 = vsel %vm479_vm2, %v1066_v30, %v1067_v36  ;;  %v311_v56 = vmul.f32 %v1701_v3, %v1722_v9  ;;  %v312_v60 = vmul.f32 %v1701_v3, %v1725_v10 }
  0x69   : > { %v1070_v57 = vsel %vm479_vm2, %v1067_v36, %v1069_v49  ;;  %v1104_v62 = vadd.f32 %v1068_v55, %v982_v46  ;;  %v313_v63 = vmul.f32 %v1701_v3, %v1737_v16  ;;  %v434_v0 = vmul.f32 %v1709_v4, %v1722_v9 }
  0x6a   : > { %v1105_v1 = vadd.f32 %v1070_v57, %v983_v52  ;;  %v362_v6 = vrot.slane %v311_v56, 1  ;;  %v363_v7 = vrot.slane %v312_v60, 1  ;;  %v435_v11 = vmul.f32 %v1709_v4, %v1725_v10 }
  0x6b   : > { %v1124_v12 = vadd.f32 %v1827_v37, %v1104_v62  ;;  %v365_v13 = vrot.slane %v313_v63, 1  ;;  %v436_v14 = vmul.f32 %v1709_v4, %v1737_v16  ;;  %v485_v19 = vrot.slane %v434_v0, 2 }
  0x6c   : > { %v1125_v21 = vadd.f32 %v1827_v37, %v1105_v1  ;;  %v364_v22 = vsel %vm356_vm1, %v362_v6, %v363_v7  ;;  %v486_v8 = vrot.slane %v435_v11, 2  ;;  %v556_v9 = vmul.f32 %v1716_v5, %v1773_v44 }
  0x6d   : > { %v1140_v17 = vmax.f32 %v1124_v12, 0.0  ;;  %v366_v25 = vsel %vm356_vm1, %v363_v7, %v365_v13  ;;  %v415_v30 = vadd.f32 %v364_v22, %v276_v40  ;;  %v488_v10 = vrot.slane %v436_v14, 2 }
  0x6e   : > { %v1141_v31 = vmax.f32 %v1125_v21, 0.0  ;;  %v416_v32 = vadd.f32 %v366_v25, %v277_v51  ;;  %v487_v36 = vsel %vm479_vm2, %v485_v19, %v486_v8  ;;  %v557_v16 = vmul.f32 %v1716_v5, %v1791_v54 }
  0x6f   : > { %v489_v45 = vsel %vm479_vm2, %v486_v8, %v488_v10  ;;  %v538_v46 = vadd.f32 %v487_v36, %v415_v30  ;;  %v591_v49 = vmul.f32 %v1734_v15, %v1773_v44  ;;  %v592_v52 = vmul.f32 %v1734_v15, %v1791_v54 }
  0x70   : > { %v1150_v55 = vpack.c.bf16 %v1141_v31, %v1140_v17  ;;  %v539_v56 = vadd.f32 %v489_v45, %v416_v32  ;;  %v593_v40 = vmul.f32 %v1734_v15, %v1794_v59  ;;  %v713_v51 = vmul.f32 %v1750_v29, %v1773_v44 }
  0x71   : > { %v572_v60 = vadd.f32 %v556_v9, %v538_v46  ;;  %v641_v57 = vrot.slane %v591_v49, 1  ;;  %v642_v62 = vrot.slane %v592_v52, 1  ;;  %v714_v63 = vmul.f32 %v1750_v29, %v1791_v54 }
  0x72   : > { %1380 = vmatmul.msk.bf16.vlgmr.msra.gmra.mxu3 %vm1157_vm3, %v1150_v55  ;;  %v573_v0 = vadd.f32 %v557_v16, %v539_v56  ;;  %v644_v1 = vrot.slane %v593_v40, 1  ;;  %v715_v6 = vmul.f32 %v1750_v29, %v1794_v59  ;;  %v763_v7 = vrot.slane %v713_v51, 2 }
  0x73   : > { %v643_v11 = vsel %vm356_vm1, %v641_v57, %v642_v62  ;;  %v764_v12 = vrot.slane %v714_v63, 2  ;;  %v834_v44 = vmul.f32 %v1762_v34, %v1830_v38  ;;  %v835_v13 = vmul.f32 %v1762_v34, %v1837_v47 }
  0x74   : > { %v645_v14 = vsel %vm356_vm1, %v642_v62, %v644_v1  ;;  %v694_v54 = vadd.f32 %v643_v11, %v572_v60  ;;  %v766_v19 = vrot.slane %v715_v6, 2  ;;  %v869_v21 = vmul.f32 %v1770_v43, %v1830_v38 }
  0x75   : > { %v695_v22 = vadd.f32 %v645_v14, %v573_v0  ;;  %v765_v59 = vsel %vm479_vm2, %v763_v7, %v764_v12  ;;  %v870_v8 = vmul.f32 %v1770_v43, %v1837_v47  ;;  %v871_v9 = vmul.f32 %v1770_v43, %v1848_v58 }
  0x76   : > { %v767_v17 = vsel %vm479_vm2, %v764_v12, %v766_v19  ;;  %v816_v25 = vadd.f32 %v765_v59, %v694_v54  ;;  %v919_v30 = vrot.slane %v869_v21, 1  ;;  %v991_v10 = vmul.f32 %v1788_v53, %v1830_v38 }
  0x77   : > { %v817_v31 = vadd.f32 %v767_v17, %v695_v22  ;;  %v920_v32 = vrot.slane %v870_v8, 1  ;;  %v922_v36 = vrot.slane %v871_v9, 1  ;;  %v992_v16 = vmul.f32 %v1788_v53, %v1837_v47 }
  0x78   : > { %v850_v45 = vadd.f32 %v834_v44, %v816_v25  ;;  %v993_v46 = vmul.f32 %v1788_v53, %v1848_v58  ;;  %v1041_v49 = vrot.slane %v991_v10, 2  ;;  %v280_v52 = vmul.f32 %v1696_v2, %v1830_v38 }
  0x79   : > { %v851_v55 = vadd.f32 %v835_v13, %v817_v31  ;;  %v921_v56 = vsel %vm356_vm1, %v919_v30, %v920_v32  ;;  %v923_v40 = vsel %vm356_vm1, %v920_v32, %v922_v36  ;;  %v1042_v51 = vrot.slane %v992_v16, 2 }
  0x7a   : > { %v972_v60 = vadd.f32 %v921_v56, %v850_v45  ;;  %v1044_v57 = vrot.slane %v993_v46, 2  ;;  %v281_v62 = vmul.f32 %v1696_v2, %v1837_v47  ;;  %v317_v63 = vmul.f32 %v1701_v3, %v1830_v38 }
  0x7b   : > { %v973_v0 = vadd.f32 %v923_v40, %v851_v55  ;;  %v1043_v1 = vsel %vm479_vm2, %v1041_v49, %v1042_v51  ;;  %v318_v6 = vmul.f32 %v1701_v3, %v1837_v47  ;;  %v319_v7 = vmul.f32 %v1701_v3, %v1848_v58 }
  0x7c   : > { %v1045_v11 = vsel %vm479_vm2, %v1042_v51, %v1044_v57  ;;  %v1094_v12 = vadd.f32 %v1043_v1, %v972_v60  ;;  %v372_v44 = vrot.slane %v317_v63, 1  ;;  %v440_v13 = vmul.f32 %v1709_v4, %v1830_v38 }
  0x7d   : > { %v1095_v14 = vadd.f32 %v1045_v11, %v973_v0  ;;  %v373_v54 = vrot.slane %v318_v6, 1  ;;  %v375_v19 = vrot.slane %v319_v7, 1  ;;  %v441_v21 = vmul.f32 %v1709_v4, %v1837_v47 }
  0x7e   : > { %v1114_v22 = vadd.f32 %v1827_v37, %v1094_v12  ;;  %v442_v59 = vmul.f32 %v1709_v4, %v1848_v58  ;;  %v495_v8 = vrot.slane %v440_v13, 2  ;;  %v560_v9 = vmul.f32 %v1716_v5, %v1867_v27 }
  0x7f   : > { %v1115_v17 = vadd.f32 %v1827_v37, %v1095_v14  ;;  %v374_v25 = vsel %vm356_vm1, %v372_v44, %v373_v54  ;;  %v376_v38 = vsel %vm356_vm1, %v373_v54, %v375_v19  ;;  %v496_v30 = vrot.slane %v441_v21, 2 }
  0x80   : > { %v1130_v10 = vmax.f32 %v1114_v22, 0.0  ;;  %v419_v31 = vadd.f32 %v374_v25, %v280_v52  ;;  %v420_v32 = vadd.f32 %v376_v38, %v281_v62  ;;  %v498_v47 = vrot.slane %v442_v59, 2 }
  0x81   : > { %v1131_v36 = vmax.f32 %v1115_v17, 0.0  ;;  %v497_v16 = vsel %vm479_vm2, %v495_v8, %v496_v30  ;;  %v561_v58 = vmul.f32 %v1716_v5, %v1874_v33  ;;  %v597_v45 = vmul.f32 %v1734_v15, %v1867_v27 }
  0x82   : > { %v499_v46 = vsel %vm479_vm2, %v496_v30, %v498_v47  ;;  %v542_v49 = vadd.f32 %v497_v16, %v419_v31  ;;  %v598_v55 = vmul.f32 %v1734_v15, %v1874_v33  ;;  %v599_v52 = vmul.f32 %v1734_v15, %v1880_v41 }
  0x83   : > { %v1145_v56 = vpack.c.bf16 %v1131_v36, %v1130_v10  ;;  %v543_v40 = vadd.f32 %v499_v46, %v420_v32  ;;  %v651_v51 = vrot.slane %v597_v45, 1  ;;  %v719_v60 = vmul.f32 %v1750_v29, %v1867_v27 }
  0x84   : > { %v576_v57 = vadd.f32 %v560_v9, %v542_v49  ;;  %v652_v62 = vrot.slane %v598_v55, 1  ;;  %v654_v63 = vrot.slane %v599_v52, 1  ;;  %v720_v0 = vmul.f32 %v1750_v29, %v1874_v33 }
  0x85   : > { %1375 = vmatmul.msk.bf16.gmra.mxu0 %vm1157_vm3, %v1145_v56  ;;  %v577_v1 = vadd.f32 %v561_v58, %v543_v40  ;;  %v721_v6 = vmul.f32 %v1750_v29, %v1880_v41  ;;  %v773_v7 = vrot.slane %v719_v60, 2  ;;  %v838_v11 = vmul.f32 %v1762_v34, %v1909_v23 }
  0x86   : > { %v653_v12 = vsel %vm356_vm1, %v651_v51, %v652_v62  ;;  %v655_v27 = vsel %vm356_vm1, %v652_v62, %v654_v63  ;;  %v774_v44 = vrot.slane %v720_v0, 2  ;;  %v839_v13 = vmul.f32 %v1762_v34, %v1923_v42 }
  0x87   : > { %v698_v14 = vadd.f32 %v653_v12, %v576_v57  ;;  %v699_v33 = vadd.f32 %v655_v27, %v577_v1  ;;  %v776_v54 = vrot.slane %v721_v6, 2  ;;  %v875_v19 = vmul.f32 %v1770_v43, %v1909_v23 }
  0x88   : > { %v775_v41 = vsel %vm479_vm2, %v773_v7, %v774_v44  ;;  %v876_v21 = vmul.f32 %v1770_v43, %v1923_v42  ;;  %v877_v22 = vmul.f32 %v1770_v43, %v1929_v50  ;;  %v997_v59 = vmul.f32 %v1788_v53, %v1909_v23 }
  0x89   : > { %v777_v8 = vsel %vm479_vm2, %v774_v44, %v776_v54  ;;  %v820_v9 = vadd.f32 %v775_v41, %v698_v14  ;;  %v929_v17 = vrot.slane %v875_v19, 1  ;;  %v998_v25 = vmul.f32 %v1788_v53, %v1923_v42 }
  0x8a   : > { %v821_v38 = vadd.f32 %v777_v8, %v699_v33  ;;  %v930_v30 = vrot.slane %v876_v21, 1  ;;  %v932_v10 = vrot.slane %v877_v22, 1  ;;  %v999_v31 = vmul.f32 %v1788_v53, %v1929_v50  ;;  %v2217_v22 = vld [vmem:[%s2427_s1 + $0x3] ss:$0 sm:$0xff] }
  0x8b   : > { %v854_v32 = vadd.f32 %v838_v11, %v820_v9  ;;  %v1051_v47 = vrot.slane %v997_v59, 2  ;;  %v1052_v36 = vrot.slane %v998_v25, 2  ;;  %v284_v16 = vmul.f32 %v1696_v2, %v1909_v23 }
  0x8c   : > { %v855_v58 = vadd.f32 %v839_v13, %v821_v38  ;;  %v931_v45 = vsel %vm356_vm1, %v929_v17, %v930_v30  ;;  %v933_v46 = vsel %vm356_vm1, %v930_v30, %v932_v10  ;;  %v1054_v49 = vrot.slane %v999_v31, 2 }
  0x8d   : > { %v976_v55 = vadd.f32 %v931_v45, %v854_v32  ;;  %v1053_v52 = vsel %vm479_vm2, %v1051_v47, %v1052_v36  ;;  %v285_v56 = vmul.f32 %v1696_v2, %v1923_v42  ;;  %v323_v40 = vmul.f32 %v1701_v3, %v1909_v23 }
  0x8e   : > { %v977_v51 = vadd.f32 %v933_v46, %v855_v58  ;;  %v1055_v60 = vsel %vm479_vm2, %v1052_v36, %v1054_v49  ;;  %v324_v57 = vmul.f32 %v1701_v3, %v1923_v42  ;;  %v325_v62 = vmul.f32 %v1701_v3, %v1929_v50 }
  0x8f   : > { %v1098_v63 = vadd.f32 %v1053_v52, %v976_v55  ;;  %v382_v0 = vrot.slane %v323_v40, 1  ;;  %v446_v1 = vmul.f32 %v1709_v4, %v1909_v23  ;;  %v447_v2 = vmul.f32 %v1709_v4, %v1923_v42 }
  0x90   : > { %v1099_v6 = vadd.f32 %v1055_v60, %v977_v51  ;;  %v383_v7 = vrot.slane %v324_v57, 1  ;;  %v385_v11 = vrot.slane %v325_v62, 1  ;;  %v448_v12 = vmul.f32 %v1709_v4, %v1929_v50 }
  0x91   : > { %v1118_v27 = vadd.f32 %v1827_v37, %v1098_v63  ;;  %v505_v44 = vrot.slane %v446_v1, 2  ;;  %v506_v13 = vrot.slane %v447_v2, 2  ;;  %v564_v3 = vmul.f32 %v1716_v5, %v1948_v18 }
  0x92   : > { %v1119_v14 = vadd.f32 %v1827_v37, %v1099_v6  ;;  %v384_v23 = vsel %vm356_vm1, %v382_v0, %v383_v7  ;;  %v386_v33 = vsel %vm356_vm1, %v383_v7, %v385_v11  ;;  %v508_v42 = vrot.slane %v448_v12, 2 }
  0x93   : > { %v1134_v54 = vmax.f32 %v1118_v27, 0.0  ;;  %v423_v19 = vadd.f32 %v384_v23, %v284_v16  ;;  %v424_v41 = vadd.f32 %v386_v33, %v285_v56  ;;  %v507_v21 = vsel %vm479_vm2, %v505_v44, %v506_v13  ;;  %v1479_v27 = vld [vmem:[%s2427_s1] ss:$0 sm:$0xff] }
  0x94   : > { %v1135_v4 = vmax.f32 %v1119_v14, 0.0  ;;  %v509_v50 = vsel %vm479_vm2, %v506_v13, %v508_v42  ;;  %v565_v5 = vmul.f32 %v2217_v22, %v1952_v24  ;;  %v603_v59 = vmul.f32 %v1734_v15, %v1948_v18 }
  0x95   : > { %v546_v8 = vadd.f32 %v507_v21, %v423_v19  ;;  %v547_v9 = vadd.f32 %v509_v50, %v424_v41  ;;  %v604_v17 = vmul.f32 %v1734_v15, %v1952_v24  ;;  %v605_v25 = vmul.f32 %v1734_v15, %v1965_v39  ;;  %v1481_v50 = vld [vmem:[%s2427_s1 + $0x2] ss:$0 sm:$0xff] }
  0x96   : > { %v1147_v38 = vpack.c.bf16 %v1135_v4, %v1134_v54  ;;  %v661_v30 = vrot.slane %v603_v59, 1  ;;  %v725_v10 = vmul.f32 %v1750_v29, %v1948_v18  ;;  %v726_v31 = vmul.f32 %v1750_v29, %v1952_v24  ;;  %v1480_v54 = vld [vmem:[%s2427_s1 + $0x1] ss:$0 sm:$0xff] }
  0x97   : > { %v580_v32 = vadd.f32 %v564_v3, %v546_v8  ;;  %v581_v47 = vadd.f32 %v565_v5, %v547_v9  ;;  %v662_v36 = vrot.slane %v604_v17, 1  ;;  %v664_v16 = vrot.slane %v605_v25, 1 }
  0x98   : > { %1377 = vmatmul.msk.bf16.gmra.mxu1 %vm1157_vm3, %v1147_v38  ;;  %v727_v58 = vmul.f32 %v1750_v29, %v1965_v39  ;;  %v783_v45 = vrot.slane %v725_v10, 2  ;;  %v784_v46 = vrot.slane %v726_v31, 2  ;;  %v842_v15 = vmul.f32 %v1762_v34, %v1990_v26 }
  0x99   : > { %v663_v49 = vsel %vm356_vm1, %v661_v30, %v662_v36  ;;  %v665_v18 = vsel %vm356_vm1, %v662_v36, %v664_v16  ;;  %v843_v24 = vmul.f32 %v1762_v34, %v1999_v35  ;;  %v881_v55 = vmul.f32 %v1770_v43, %v1990_v26 }
  0x9a   : > { %v702_v52 = vadd.f32 %v663_v49, %v580_v32  ;;  %v703_v56 = vadd.f32 %v665_v18, %v581_v47  ;;  %v785_v40 = vsel %vm479_vm2, %v783_v45, %v784_v46  ;;  %v786_v29 = vrot.slane %v727_v58, 2 }
  0x9b   : > { %v882_v39 = vmul.f32 %v1770_v43, %v1999_v35  ;;  %v883_v51 = vmul.f32 %v1770_v43, %v2010_v61  ;;  %v939_v60 = vrot.slane %v881_v55, 1  ;;  %v1003_v57 = vmul.f32 %v1788_v53, %v1990_v26 }
  0x9c   : > { %v787_v34 = vsel %vm479_vm2, %v784_v46, %v786_v29  ;;  %v824_v62 = vadd.f32 %v785_v40, %v702_v52  ;;  %v1004_v63 = vmul.f32 %v1788_v53, %v1999_v35  ;;  %v1005_v0 = vmul.f32 %v1788_v53, %v2010_v61  ;;  %v269_v52 = vld [vmem:[%s1711_s14 + $0xd8] sm:$0xff]  ;;  %v1483_v29 = vld [vmem:[%s2427_s1 + $0x5] ss:$0 sm:$0xff] }
  0x9d   : > { %v825_v1 = vadd.f32 %v787_v34, %v703_v56  ;;  %v940_v2 = vrot.slane %v882_v39, 1  ;;  %v942_v6 = vrot.slane %v883_v51, 1  ;;  %v1061_v7 = vrot.slane %v1003_v57, 2 }
  0x9e   : > { %v858_v11 = vadd.f32 %v842_v15, %v824_v62  ;;  %v1062_v12 = vrot.slane %v1004_v63, 2  ;;  %v1064_v43 = vrot.slane %v1005_v0, 2  ;;  %v288_v44 = vmul.f32 %v1479_v27, %v1990_v26 }
  0x9f   : > { %v859_v13 = vadd.f32 %v843_v24, %v825_v1  ;;  %v941_v3 = vsel %vm356_vm1, %v939_v60, %v940_v2  ;;  %v943_v14 = vsel %vm356_vm1, %v940_v2, %v942_v6  ;;  %v289_v53 = vmul.f32 %v1479_v27, %v1999_v35  ;;  %v270_v60 = vld [vmem:[%s1711_s14 + $0xe0] sm:$0xff]  ;;  %v271_v6 = vld [vmem:[%s1711_s14 + $0xe8] sm:$0x3] }
  0xa0   : > { %v980_v23 = vadd.f32 %v941_v3, %v858_v11  ;;  %v1063_v33 = vsel %vm479_vm2, %v1061_v7, %v1062_v12  ;;  %v1065_v42 = vsel %vm479_vm2, %v1062_v12, %v1064_v43  ;;  %v329_v19 = vmul.f32 %v1480_v54, %v1990_v26 }
  0xa1   : > { %v981_v41 = vadd.f32 %v943_v14, %v859_v13  ;;  %v330_v21 = vmul.f32 %v1480_v54, %v1999_v35  ;;  %v331_v4 = vmul.f32 %v1480_v54, %v2010_v61  ;;  %v452_v5 = vmul.f32 %v1481_v50, %v1990_v26  ;;  %v1485_v14 = vld [vmem:[%s2427_s1 + $0x7] ss:$0 sm:$0xff] }
  0xa2   : > { %v1102_v59 = vadd.f32 %v1063_v33, %v980_v23  ;;  %v392_v8 = vrot.slane %v329_v19, 1  ;;  %v453_v9 = vmul.f32 %v1481_v50, %v1999_v35  ;;  %v454_v17 = vmul.f32 %v1481_v50, %v2010_v61  ;;  %v1486_v19 = vld [vmem:[%s2427_s1 + $0x8] ss:$0 sm:$0xff] }
  0xa3   : > { %v1103_v25 = vadd.f32 %v1065_v42, %v981_v41  ;;  %v393_v38 = vrot.slane %v330_v21, 1  ;;  %v395_v30 = vrot.slane %v331_v4, 1  ;;  %v515_v10 = vrot.slane %v452_v5, 2 }
  0xa4   : > { %v1122_v31 = vadd.f32 %v1827_v37, %v1102_v59  ;;  %v516_v32 = vrot.slane %v453_v9, 2  ;;  %v518_v47 = vrot.slane %v454_v17, 2  ;;  %v568_v36 = vmul.f32 %v2217_v22, %v2023_v20 }
  0xa5   : > { %v1123_v26 = vadd.f32 %v1827_v37, %v1103_v25  ;;  %v394_v16 = vsel %vm356_vm1, %v392_v8, %v393_v38  ;;  %v396_v35 = vsel %vm356_vm1, %v393_v38, %v395_v30  ;;  %v569_v61 = vmul.f32 %v2217_v22, %v2030_v28  ;;  %v1482_v37 = vld [vmem:[%s2427_s1 + $0x4] ss:$0 sm:$0xff] }
  0xa6   : > { %v1138_v58 = vmax.f32 %v1122_v31, 0.0  ;;  %v427_v45 = vadd.f32 %v394_v16, %v288_v44  ;;  %v428_v46 = vadd.f32 %v396_v35, %v289_v53  ;;  %v517_v15 = vsel %vm479_vm2, %v515_v10, %v516_v32 }
  0xa7   : > { %v1139_v49 = vmax.f32 %v1123_v26, 0.0  ;;  %v519_v18 = vsel %vm479_vm2, %v516_v32, %v518_v47  ;;  %v609_v24 = vmul.f32 %v1482_v37, %v2023_v20  ;;  %v610_v55 = vmul.f32 %v1482_v37, %v2030_v28 }
  0xa8   : > { %v550_v22 = vadd.f32 %v517_v15, %v427_v45  ;;  %v551_v56 = vadd.f32 %v519_v18, %v428_v46  ;;  %v611_v40 = vmul.f32 %v1482_v37, %v2038_v48  ;;  %v731_v39 = vmul.f32 %v1483_v29, %v2023_v20  ;;  %v1484_v20 = vld [vmem:[%s2427_s1 + $0x6] ss:$0 sm:$0xff] }
  0xa9   : > { %v1149_v51 = vpack.c.bf16 %v1139_v49, %v1138_v58  ;;  %v671_v57 = vrot.slane %v609_v24, 1  ;;  %v672_v34 = vrot.slane %v610_v55, 1  ;;  %v732_v62 = vmul.f32 %v1483_v29, %v2030_v28  ;;  %v1487_v58 = vld [vmem:[%s2428_s2] ss:$0 sm:$0xff] }
  0xaa   : > { %v584_v63 = vadd.f32 %v568_v36, %v550_v22  ;;  %v585_v0 = vadd.f32 %v569_v61, %v551_v56  ;;  %v674_v1 = vrot.slane %v611_v40, 1  ;;  %v733_v2 = vmul.f32 %v1483_v29, %v2038_v48  ;;  %v2322_v61 = vld [vmem:[%s2430_s4] ss:$0 sm:$0xff] }
  0xab   : > { %1379 = vmatmul.msk.bf16.gmra.mxu2 %vm1157_vm3, %v1149_v51  ;;  %v673_v7 = vsel %vm356_vm1, %v671_v57, %v672_v34  ;;  %v793_v11 = vrot.slane %v731_v39, 2  ;;  %v794_v12 = vrot.slane %v732_v62, 2  ;;  %v846_v43 = vmul.f32 %v1484_v20, %v269_v52 }
  0xac   : > { %v675_v27 = vsel %vm356_vm1, %v672_v34, %v674_v1  ;;  %v706_v28 = vadd.f32 %v673_v7, %v584_v63  ;;  %v796_v44 = vrot.slane %v733_v2, 2  ;;  %v847_v13 = vmul.f32 %v1484_v20, %v270_v60 }
  0xad   : > { %v707_v3 = vadd.f32 %v675_v27, %v585_v0  ;;  %v795_v48 = vsel %vm479_vm2, %v793_v11, %v794_v12  ;;  %v887_v53 = vmul.f32 %v1485_v14, %v269_v52  ;;  %v888_v23 = vmul.f32 %v1485_v14, %v270_v60 }
  0xae   : > { %v797_v33 = vsel %vm479_vm2, %v794_v12, %v796_v44  ;;  %v828_v42 = vadd.f32 %v795_v48, %v706_v28  ;;  %v889_v54 = vmul.f32 %v1485_v14, %v271_v6  ;;  %v1009_v41 = vmul.f32 %v1486_v19, %v269_v52 }
  0xaf   : > { %v829_v21 = vadd.f32 %v797_v33, %v707_v3  ;;  %v949_v4 = vrot.slane %v887_v53, 1  ;;  %v950_v50 = vrot.slane %v888_v23, 1  ;;  %v1010_v5 = vmul.f32 %v1486_v19, %v270_v60 }
  0xb0   : > { %v862_v59 = vadd.f32 %v846_v43, %v828_v42  ;;  %v952_v8 = vrot.slane %v889_v54, 1  ;;  %v1011_v9 = vmul.f32 %v1486_v19, %v271_v6  ;;  %v1071_v17 = vrot.slane %v1009_v41, 2 }
  0xb1   : > { %v863_v25 = vadd.f32 %v847_v13, %v829_v21  ;;  %v951_v38 = vsel %vm356_vm1, %v949_v4, %v950_v50  ;;  %v1072_v30 = vrot.slane %v1010_v5, 2 }
  0xb2   : > { %v953_v10 = vsel %vm356_vm1, %v950_v50, %v952_v8  ;;  %v984_v31 = vadd.f32 %v951_v38, %v862_v59  ;;  %v1074_v32 = vrot.slane %v1011_v9, 2 }
  0xb3   : > { %v985_v47 = vadd.f32 %v953_v10, %v863_v25  ;;  %v1073_v36 = vsel %vm479_vm2, %v1071_v17, %v1072_v30 }
  0xb4   : > { %v1075_v26 = vsel %vm479_vm2, %v1072_v30, %v1074_v32  ;;  %v1106_v16 = vadd.f32 %v1073_v36, %v984_v31 }
  0xb5   : > { %v1107_v35 = vadd.f32 %v1075_v26, %v985_v47 }
  0xb6   : > { %v1126_v45 = vadd.f32 %v1487_v58, %v1106_v16 }
  0xb7   : > { %v1127_v46 = vadd.f32 %v1487_v58, %v1107_v35 }
  0xb8   : > { %v1142_v15 = vmax.f32 %v1126_v45, 0.0  ;;  %v1195_v49 = vpop.f32.mrf.mxu0 }
  0xb9   : > { %v1143_v18 = vmax.f32 %v1127_v46, 0.0  ;;  %v1196_v37 = vadd.f32 %v2322_v61, %v1195_v49 }
  0xbb   : > { %v1151_v24 = vpack.c.bf16 %v1143_v18, %v1142_v15  ;;  %v1235_v55 = vmax.f32 %v1196_v37, 0.0 }
  0xbd   : > { %1381 = vmatmul.msk.bf16.gmra.mxu3 %vm1157_vm3, %v1151_v24  ;;  %1252 = vst.msk [vmem:[%s2331_s17] sm:$0xff] %vm1251_vm4, %v1235_v55 }
  0xc0   : > { %v1197_v40 = vpop.f32.mrf.mxu0 }
  0xc1   : > { %v1198_v39 = vadd.f32 %v2322_v61, %v1197_v40 }
  0xc3   : > { %v1236_v60 = vmax.f32 %v1198_v39, 0.0 }
  0xc5   : > { %1253 = vst.msk [vmem:[%s2331_s17 + $0x8] sm:$0xff] %vm1251_vm4, %v1236_v60 }
  0xca   : > { %v1205_v52 = vpop.f32.mrf.mxu1 }
  0xcb   : > { %v1206_v22 = vadd.f32 %v2322_v61, %v1205_v52 }
  0xcd   : > { %v1239_v56 = vmax.f32 %v1206_v22, 0.0 }
  0xcf   : > { %1256 = vst.msk [vmem:[%s2331_s17 + $0x20] sm:$0xff] %vm1251_vm4, %v1239_v56 }
  0xd2   : > { %v1207_v29 = vpop.f32.mrf.mxu1 }
  0xd3   : > { %v1208_v51 = vadd.f32 %v2322_v61, %v1207_v29 }
  0xd5   : > { %v1240_v57 = vmax.f32 %v1208_v51, 0.0 }
  0xd7   : > { %1257 = vst.msk [vmem:[%s2331_s17 + $0x28] sm:$0xff] %vm1251_vm4, %v1240_v57 }
  0xe3   : > { %v1215_v34 = vpop.f32.mrf.mxu2 }
  0xe4   : > { %v1216_v62 = vadd.f32 %v2322_v61, %v1215_v34 }
  0xe6   : > { %v1243_v63 = vmax.f32 %v1216_v62, 0.0 }
  0xe8   : > { %1260 = vst.msk [vmem:[%s2331_s17 + $0x40] sm:$0xff] %vm1251_vm4, %v1243_v63 }
  0xeb   : > { %v1217_v0 = vpop.f32.mrf.mxu2 }
  0xec   : > { %v1218_v1 = vadd.f32 %v2322_v61, %v1217_v0 }
  0xee   : > { %v1244_v2 = vmax.f32 %v1218_v1, 0.0 }
  0xf0   : > { %1261 = vst.msk [vmem:[%s2331_s17 + $0x48] sm:$0xff] %vm1251_vm4, %v1244_v2 }
  0xf5   : > { %v1225_v6 = vpop.f32.mrf.mxu3 }
  0xf6   : > { %v1226_v7 = vadd.f32 %v2322_v61, %v1225_v6 }
  0xf8   : > { %v1247_v11 = vmax.f32 %v1226_v7, 0.0 }
  0xfa   : > { %1264 = vst.msk [vmem:[%s2331_s17 + $0x60] sm:$0xff] %vm1251_vm4, %v1247_v11 }
  0xfd   : > { %v1227_v12 = vpop.f32.mrf.mxu3 }
  0xfe   : > { %v1228_v20 = vadd.f32 %v2322_v61, %v1227_v12 }
 0x100   : > { %v1248_v43 = vmax.f32 %v1228_v20, 0.0 }
 0x102   : > { %1265 = vst.msk [vmem:[%s2331_s17 + $0x68] sm:$0xff] %vm1251_vm4, %v1248_v43  ;;  %v1200_v27 = vpop.f32.mrf.mxu0 }
 0x103   : > { %v1201_v28 = vadd.f32 %v2322_v61, %v1200_v27 }
 0x105   : > { %v1237_v44 = vmax.f32 %v1201_v28, 0.0 }
 0x107   : > { %1254 = vst.msk [vmem:[%s2331_s17 + $0x10] sm:$0xff] %vm1251_vm4, %v1237_v44 }
 0x10a   : > { %v1202_v14 = vpop.f32.mrf.mxu0 }
 0x10b   : > { %v1203_v23 = vadd.f32 %v2322_v61, %v1202_v14 }
 0x10d   : > { %v1238_v42 = vmax.f32 %v1203_v23, 0.0 }
 0x10f   : > { %1255 = vst.msk [vmem:[%s2331_s17 + $0x18] sm:$0xff] %vm1251_vm4, %v1238_v42 }
 0x115   : > { %v1210_v13 = vpop.f32.mrf.mxu1 }
 0x116   : > { %v1211_v3 = vadd.f32 %v2322_v61, %v1210_v13 }
 0x118   : > { %v1241_v48 = vmax.f32 %v1211_v3, 0.0 }
 0x11a   : > { %1258 = vst.msk [vmem:[%s2331_s17 + $0x30] sm:$0xff] %vm1251_vm4, %v1241_v48 }
 0x11d   : > { %v1212_v53 = vpop.f32.mrf.mxu1 }
 0x11e   : > { %v1213_v33 = vadd.f32 %v2322_v61, %v1212_v53 }
 0x120   : > { %v1242_v54 = vmax.f32 %v1213_v33, 0.0 }
 0x122   : > { %1259 = vst.msk [vmem:[%s2331_s17 + $0x38] sm:$0xff] %vm1251_vm4, %v1242_v54 }
 0x12e   : > { %v1220_v19 = vpop.f32.mrf.mxu2 }
 0x12f   : > { %v1221_v41 = vadd.f32 %v2322_v61, %v1220_v19 }
 0x131   : > { %v1245_v21 = vmax.f32 %v1221_v41, 0.0 }
 0x133   : > { %1262 = vst.msk [vmem:[%s2331_s17 + $0x50] sm:$0xff] %vm1251_vm4, %v1245_v21 }
 0x136   : > { %v1222_v4 = vpop.f32.mrf.mxu2 }
 0x137   : > { %v1223_v50 = vadd.f32 %v2322_v61, %v1222_v4 }
 0x139   : > { %v1246_v5 = vmax.f32 %v1223_v50, 0.0 }
 0x13b   : > { %1263 = vst.msk [vmem:[%s2331_s17 + $0x58] sm:$0xff] %vm1251_vm4, %v1246_v5 }
 0x140   : > { %v1230_v59 = vpop.f32.mrf.mxu3 }
 0x141   : > { %v1231_v8 = vadd.f32 %v2322_v61, %v1230_v59 }
 0x143   : > { %v1249_v9 = vmax.f32 %v1231_v8, 0.0 }
 0x145   : > { %1266 = vst.msk [vmem:[%s2331_s17 + $0x70] sm:$0xff] %vm1251_vm4, %v1249_v9 }
 0x148   : > { %v1232_v17 = vpop.f32.mrf.mxu3 }
 0x149   : > { %v1233_v25 = vadd.f32 %v2322_v61, %v1232_v17 }
 0x14b   : > { %v1250_v38 = vmax.f32 %v1233_v25, 0.0 }
 0x14d   : > { %1267 = vst.msk [vmem:[%s2331_s17 + $0x78] sm:$0xff] %vm1251_vm4, %v1250_v38 }
 0x14e   : > { %1515 = shalt.err (!%p1512_p6)
}
 0x14f   : > { %s1584_s30 = smov 128   ;;  %s1585_s17 = smov 8  }
 0x150   : > { %1394 = dma.vmem_to_hbm [thread:$0]  (%p1667_p3), %s1285_s9, 2048, %s1287_s10, %s1269_s21, %s1584_s30, %s1584_s30, %s1585_s17  }
 0x151 PF: > { %p1400_p7 = scmp.ge.s32.totalorder %s1582_s25, 2  ;;  %s1301_s14 = sand.u32 1, %s1554_s18  }
 0x152   : > { %s1302_s27 = scalar_lea.sflag [#allocation3], %s1301_s14 }
 0x153   : > { %p1397_p9 = pnand %p1400_p7, %p1676_p8 }
 0x155   : > { %p1398_p10 = pneg %p1397_p9 }
 0x157   : > { %1549 = dma.done.wait (%p1398_p10), %s1302_s27, 2048  }
 0x158   : > { %1551 = vsyncadd (%p1398_p10), %s1302_s27, 4294965248  ;;  %s18_s25 = sadd.s32 1, %s1582_s25   ;;  %s2436_s18 = smov %s1558_s19 }
 0x159   : > { %p15_p11 = scmp.ge.s32.totalorder %s18_s25, 6   ;;  %s2437_s19 = smov %s1562_s20 }
 0x15a   : > { %s2438_s20 = smov %s1685_s11  ;;  %s2439_s21 = smov %s1574_s23 }
 0x15b   : > { %s2440_s22 = smov %s1578_s24  ;;  %s2441_s23 = smov %s2444_s28 }
 0x15c   : > { %s2442_s24 = smov %s2448_s29  ;;  %17 = sbr.rel (!%p15_p11) target bundleno = 7 (0x7), region = 76 }
 0x161   :  { %1308 = vsyncpa [#allocation3], 1 }
 0x162   :  { %1310 = vsyncpa [#allocation3 + $0x1], 1 }

</bundles_post_ra>
